<compile_context>
chip_gen: v6e
topology: v6e:2x2x1
jax: 0.10.0
libtpu: 0.0.40
codegen_flags: <defaults>
</compile_context>

<pallas_src>
import jax
import jax.numpy as jnp
from jax.experimental import pallas as pl
from jax.experimental.pallas import tpu as pltpu


def _round_up(x, m):
    return ((x + m - 1) // m) * m


def _cdiv(a, b):
    return -(-a // b)


def _vmem_capacity_bytes():
    """Physical per-core VMEM; falls back to the smallest current part (v7x)."""
    try:
        info = pltpu.get_tpu_info()
        cap = getattr(info, "vmem_capacity_bytes", None)
        if cap:
            return int(cap)
    except Exception:
        pass
    return 64 * 1024 * 1024


def _balanced_tile(dim, t_max, align):
    """Split `dim` into equal-ish aligned tiles: returns (tile, padded_dim, n_blocks).

    Padding waste is capped at one `align` group per block (vs. up to ~2x when
    clamping the tile to t_max and rounding the dim up to it)."""
    dim_al = _round_up(max(dim, 1), align)
    if dim_al <= t_max:
        return dim_al, dim_al, 1
    n_blocks = _cdiv(dim_al, t_max)
    tile = _round_up(_cdiv(dim_al, n_blocks), align)
    return tile, tile * n_blocks, n_blocks


# ----------------------------- kernels ---------------------------------------


def _matmul_bias_kernel(x_ref, w_ref, b_ref, o_ref):
    """Whole contraction dim is resident in VMEM: no accumulator scratch."""
    o_ref[...] = (
        jnp.dot(x_ref[...], w_ref[...], preferred_element_type=jnp.float32)
        + b_ref[...]
    ).astype(o_ref.dtype)


def _matmul_bias_acc_kernel(x_ref, w_ref, b_ref, o_ref, acc_ref):
    """K split across grid axis 2 (wrapper guarantees >= 2 K steps)."""
    k = pl.program_id(2)
    nk = pl.num_programs(2)
    partial = jnp.dot(x_ref[...], w_ref[...], preferred_element_type=jnp.float32)

    @pl.when(k == 0)
    def _():
        acc_ref[...] = partial                      # no separate zero-init pass

    @pl.when(jnp.logical_and(k > 0, k < nk - 1))
    def _():
        acc_ref[...] += partial

    @pl.when(k == nk - 1)
    def _():
        # Fuse the final partial product and the bias into the output store.
        o_ref[...] = (acc_ref[...] + partial + b_ref[...]).astype(o_ref.dtype)


# ----------------------------- wrapper ----------------------------------------


def sparse_linear_forward(x, indices, values, bias, in_features, out_features,
                          *, compute_dtype=None, tm_max=None, tn_max=None,
                          tk_max=None, resident_w_bytes=None):
    """Pallas implementation of SparseLinear.forward.

    x       : (..., in_features)
    indices : (2, nnz) int   -- COO (row, col) into (out_features, in_features)
    values  : (nnz,)   float -- weights (duplicates summed, torch.sparse style)
    bias    : (out_features,) or None
    compute_dtype : optional (e.g. jnp.bfloat16) MXU compute dtype for x/W;
                    default keeps float32 for exact parity with the reference.
    """
    out_dtype = x.dtype
    cdt = jnp.dtype(compute_dtype) if compute_dtype is not None else jnp.dtype(jnp.float32)
    isz = cdt.itemsize                      # x / W itemsize in the kernel
    osz = jnp.dtype(out_dtype).itemsize     # output itemsize
    # Sublane packing: f32 -> 8 rows, bf16 -> 16, int8/fp8 -> 32.
    sub = {4: 8, 2: 16, 1: 32}[min(isz, osz)]

    # ---- generation-aware budgets (v5e/v6e: 128 MiB VMEM, v7x: 64 MiB) ------
    vmem_cap = _vmem_capacity_bytes()
    big_vmem = vmem_cap >= (128 << 20)
    vmem_budget = min(vmem_cap // 2, 64 << 20)       # scoped limit w/ headroom
    if resident_w_bytes is None:
        # W is (conservatively) double-buffer allocated even with a constant
        # index_map, so the single-copy cap is half the leftover budget.
        resident_w_bytes = vmem_budget // 2
    maybe_two_cores = vmem_cap < (100 << 20)         # v7x heuristic (2 TCs)
    if tm_max is None:
        tm_max = 1024 if big_vmem else 512
    if tn_max is None:
        tn_max = 1024 if big_vmem else 512
    if tk_max is None:
        tk_max = 2048 if big_vmem else 1024

    output_shape = x.shape[:-1] + (out_features,)
    x_flat = x.reshape(-1, in_features)
    M = x_flat.shape[0]

    k_al = _round_up(in_features, 128)
    n_al = _round_up(out_features, 128)

    # ---------------- choose a path + tile geometry (static Python) ----------
    use_resident_w = (k_al * n_al * isz) <= resident_w_bytes
    if use_resident_w:
        K_pad, N_pad, tk, tn, nK, nN = k_al, n_al, k_al, n_al, 1, 1
        tm, M_pad, nM = _balanced_tile(M, tm_max, sub)
        if maybe_two_cores and nM == 1 and M > sub:
            # v7x has 2 TensorCores: give the parallel M axis >= 2 blocks.
            tm = _round_up(_cdiv(M, 2), sub)
            nM, M_pad = 2, 2 * tm

        def _fast_fp(tm_):
            return (2 * K_pad * N_pad * isz        # resident weight (2 bufs)
                    + 2 * tm_ * K_pad * isz        # double-buffered x tile
                    + 2 * tm_ * N_pad * osz        # double-buffered out tile
                    + 2 * N_pad * 4)               # bias

        while _fast_fp(tm) > vmem_budget and tm > sub:
            tm = max(sub, _round_up(tm // 2, sub))
            nM = _cdiv(M, tm)
            M_pad = nM * tm
        footprint = _fast_fp(tm)
        if footprint > vmem_budget:
            use_resident_w = False                 # weight too big: tile it

    if not use_resident_w:
        tk, K_pad, nK = _balanced_tile(in_features, tk_max, 128)
        tn, N_pad, nN = _balanced_tile(out_features, tn_max, 128)
        tm, M_pad, nM = _balanced_tile(M, tm_max, sub)

        def _tiled_fp(tm_, tn_, tk_):
            return (2 * tm_ * tk_ * isz + 2 * tk_ * tn_ * isz
                    + 2 * tm_ * tn_ * osz + tm_ * tn_ * 4 + 2 * tn_ * 4)

        # Shrink K, then N, then M tiles until the working set fits the
        # generation's scoped-VMEM budget (no hard-coded 48 MiB cap).
        while _tiled_fp(tm, tn, tk) > vmem_budget:
            if tk > 128:
                tk, K_pad, nK = _balanced_tile(in_features, max(128, tk // 2), 128)
            elif tn > 128:
                tn, N_pad, nN = _balanced_tile(out_features, max(128, tn // 2), 128)
            elif tm > sub:
                tm, M_pad, nM = _balanced_tile(M, max(sub, tm // 2), sub)
            else:
                break
        footprint = _tiled_fp(tm, tn, tk)

    # ---------------- wrapper-side layout plumbing (cheap XLA ops) -----------
    # Padded, pre-transposed dense weight built with ONE scatter-add
    # (duplicate COO entries sum -> torch.sparse_coo_tensor semantics).
    # TODO(synk): true sparse (COO) matmul has no Pallas primitive; we densify.
    w_t = jnp.zeros((K_pad, N_pad), jnp.float32)
    w_t = w_t.at[indices[1], indices[0]].add(values.astype(jnp.float32))
    w_t = w_t.astype(cdt)

    b1d = bias if bias is not None else jnp.zeros((out_features,), jnp.float32)
    b2d = jnp.pad(b1d.astype(jnp.float32),
                  (0, N_pad - out_features)).reshape(1, N_pad)

    if (M_pad, K_pad) != (M, in_features):
        x_flat = jnp.pad(x_flat, ((0, M_pad - M), (0, K_pad - in_features)))
    x_flat = x_flat.astype(cdt)

    vmem_limit = int(min(vmem_budget,
                         max(footprint * 5 // 4 + (1 << 20), 8 << 20)))

    if use_resident_w:
        # Fast path: W loaded once (constant index_map), grid streams M only.
        grid = (nM,)
        in_specs = [
            pl.BlockSpec((tm, K_pad), lambda i: (i, 0)),
            pl.BlockSpec((K_pad, N_pad), lambda i: (0, 0)),
            pl.BlockSpec((1, N_pad), lambda i: (0, 0)),
        ]
        out_specs = pl.BlockSpec((tm, N_pad), lambda i: (i, 0))
        scratch = []
        semantics = ("parallel",)
        kernel = _matmul_bias_kernel
        bytes_accessed = (M_pad * K_pad * isz + K_pad * N_pad * isz
                          + M_pad * N_pad * osz + N_pad * 4)
    elif nK == 1:
        # K fits one tile but W must be tiled over N: 2-D grid, no scratch.
        grid = (nM, nN)
        in_specs = [
            pl.BlockSpec((tm, K_pad), lambda i, j: (i, 0)),
            pl.BlockSpec((K_pad, tn), lambda i, j: (0, j)),
            pl.BlockSpec((1, tn), lambda i, j: (0, j)),
        ]
        out_specs = pl.BlockSpec((tm, tn), lambda i, j: (i, j))
        scratch = []
        semantics = ("parallel", "parallel")
        kernel = _matmul_bias_kernel
        bytes_accessed = (M_pad * K_pad * isz * nN + K_pad * N_pad * isz * nM
                          + M_pad * N_pad * osz + nM * N_pad * 4)
    else:
        # General tiled path: 3-D grid, f32 accumulator resident across K.
        grid = (nM, nN, nK)
        in_specs = [
            pl.BlockSpec((tm, tk), lambda i, j, k: (i, k)),
            pl.BlockSpec((tk, tn), lambda i, j, k: (k, j)),
            pl.BlockSpec((1, tn), lambda i, j, k: (0, j)),
        ]
        out_specs = pl.BlockSpec((tm, tn), lambda i, j, k: (i, j))
        scratch = [pltpu.VMEM((tm, tn), jnp.float32)]
        semantics = ("parallel", "parallel", "arbitrary")
        kernel = _matmul_bias_acc_kernel
        # x is re-read nN times, W re-read nM times under this grid.
        bytes_accessed = (M_pad * K_pad * isz * nN + K_pad * N_pad * isz * nM
                          + M_pad * N_pad * osz + nM * N_pad * 4)

    cost = pl.CostEstimate(flops=2 * M_pad * N_pad * K_pad,
                           transcendentals=0,
                           bytes_accessed=int(bytes_accessed))

    out = pl.pallas_call(
        kernel,
        out_shape=jax.ShapeDtypeStruct((M_pad, N_pad), out_dtype),
        grid_spec=pltpu.PrefetchScalarGridSpec(
            num_scalar_prefetch=0,
            grid=grid,
            in_specs=in_specs,
            out_specs=out_specs,
            scratch_shapes=scratch,
        ),
        compiler_params=pltpu.CompilerParams(
            dimension_semantics=semantics,
            vmem_limit_bytes=vmem_limit),
        cost_estimate=cost,
    )(x_flat, w_t, b2d)

    return out[:M, :out_features].reshape(output_shape)


# ----------------------------- reference & demo -------------------------------


def _reference(x, indices, values, bias, in_features, out_features):
    w_ref = jnp.zeros((out_features, in_features), jnp.float32)
    w_ref = w_ref.at[indices[0], indices[1]].add(values)
    y = x.reshape(-1, in_features) @ w_ref.T
    if bias is not None:
        y = y + bias
    return y.reshape(x.shape[:-1] + (out_features,))


if __name__ == "__main__":
    key = jax.random.PRNGKey(0)

    # ---- case 1: small, module-consistent shapes (N, *, H_in) ---------------
    in_features, out_features = 32, 48
    batch, seq = 2, 8                        # input (2, 8, 32)
    nnz = 256

    k_rows, k_cols, k_vals, k_bias, k_x, key2 = jax.random.split(key, 6)
    rows = jax.random.randint(k_rows, (nnz,), 0, out_features, dtype=jnp.int32)
    cols = jax.random.randint(k_cols, (nnz,), 0, in_features, dtype=jnp.int32)
    indices = jnp.stack([rows, cols], axis=0)
    bound = 1.0 / (in_features ** 0.5)
    values = jax.random.uniform(k_vals, (nnz,), jnp.float32, -bound, bound)
    bias = jax.random.uniform(k_bias, (out_features,), jnp.float32, -bound, bound)
    x = jax.random.normal(k_x, (batch, seq, in_features), jnp.float32)

    y = jax.block_until_ready(
        sparse_linear_forward(x, indices, values, bias, in_features, out_features))
    y_ref = _reference(x, indices, values, bias, in_features, out_features)
    assert y.shape == (batch, seq, out_features)
    assert jnp.allclose(y, y_ref, atol=1e-5, rtol=1e-5)

    # ---- case 2: non-aligned dims, multi-block M (resident-W fast path) -----
    in2, out2, b2, s2, nnz2 = 200, 300, 2, 384, 1024
    kr, kc, kv, kb, kx = jax.random.split(key2, 5)
    idx2 = jnp.stack([
        jax.random.randint(kr, (nnz2,), 0, out2, dtype=jnp.int32),
        jax.random.randint(kc, (nnz2,), 0, in2, dtype=jnp.int32)], axis=0)
    bound2 = 1.0 / (in2 ** 0.5)
    vals2 = jax.random.uniform(kv, (nnz2,), jnp.float32, -bound2, bound2)
    bias2 = jax.random.uniform(kb, (out2,), jnp.float32, -bound2, bound2)
    x2 = jax.random.normal(kx, (b2, s2, in2), jnp.float32)

    y2 = jax.block_until_ready(
        sparse_linear_forward(x2, idx2, vals2, bias2, in2, out2))
    y2_ref = _reference(x2, idx2, vals2, bias2, in2, out2)
    assert y2.shape == (b2, s2, out2)
    assert jnp.allclose(y2, y2_ref, atol=1e-4, rtol=1e-4)

    # ---- case 3: force the tiled multi-K accumulator path (3-D grid) --------
    y3 = jax.block_until_ready(
        sparse_linear_forward(x2, idx2, vals2, bias2, in2, out2,
                              resident_w_bytes=0,
                              tm_max=128, tn_max=128, tk_max=128))
    assert jnp.allclose(y3, y2_ref, atol=1e-4, rtol=1e-4)

    # ---- case 4: force the tiled single-K path (2-D grid, no scratch) -------
    y4 = jax.block_until_ready(
        sparse_linear_forward(x2, idx2, vals2, bias2, in2, out2,
                              resident_w_bytes=0,
                              tm_max=256, tn_max=128))
    assert jnp.allclose(y4, y2_ref, atol=1e-4, rtol=1e-4)

    print("KERNEL_OK")
</pallas_src>

<mosaic_0001>
module attributes {stable_mosaic.version = 11 : i64} {
  func.func @_matmul_bias_kernel(%arg0: i32, %arg1: memref<8x128xf32, #tpu.memory_space<vmem>>, %arg2: memref<128x128xf32, #tpu.memory_space<vmem>>, %arg3: memref<1x128xf32, #tpu.memory_space<vmem>>, %arg4: memref<8x128xf32, #tpu.memory_space<vmem>>) attributes {dimension_semantics = [#tpu.dimension_semantics<parallel>], iteration_bounds = array<i64: 2>, scalar_prefetch = 0 : i64, scratch_operands = 0 : i64, tpu.core_type = #tpu.core_type<tc>, window_params = [{transform_indices = @transform_0, window_bounds = array<i64: 8, 128>}, {pipeline_mode = #tpu.pipeline_mode<synchronous>, transform_indices = @transform_1, window_bounds = array<i64: 128, 128>}, {pipeline_mode = #tpu.pipeline_mode<synchronous>, transform_indices = @transform_2, window_bounds = array<i64: 1, 128>}, {transform_indices = @transform_3, window_bounds = array<i64: 8, 128>}]} {
    %c0 = arith.constant 0 : index
    %c0_0 = arith.constant 0 : index
    %0 = vector.load %arg1[%c0, %c0_0] : memref<8x128xf32, #tpu.memory_space<vmem>>, vector<8x128xf32>
    %c0_1 = arith.constant 0 : index
    %c0_2 = arith.constant 0 : index
    %1 = vector.load %arg2[%c0_1, %c0_2] : memref<128x128xf32, #tpu.memory_space<vmem>>, vector<128x128xf32>
    %cst = arith.constant dense<0.000000e+00> : vector<8x128xf32>
    %2 = tpu.matmul %0, %1, %cst {dimension_numbers = #tpu.dot_dimension_numbers<[1], [0], [0], [1], [0, 0, 1, 1], [], []>} : vector<8x128xf32>, vector<128x128xf32>, vector<8x128xf32> -> vector<8x128xf32>
    %c0_3 = arith.constant 0 : index
    %c0_4 = arith.constant 0 : index
    %3 = vector.load %arg3[%c0_3, %c0_4] : memref<1x128xf32, #tpu.memory_space<vmem>>, vector<1x128xf32>
    %4 = vector.broadcast %3 : vector<1x128xf32> to vector<8x128xf32>
    %5 = arith.addf %2, %4 : vector<8x128xf32>
    %c0_5 = arith.constant 0 : index
    %c0_6 = arith.constant 0 : index
    %6 = vector.load %arg4[%c0_5, %c0_6] : memref<8x128xf32, #tpu.memory_space<vmem>>, vector<8x128xf32>
    tpu.vector_store %arg4[%c0_5, %c0_6], %5 {strides = array<i32>} : memref<8x128xf32, #tpu.memory_space<vmem>>, vector<8x128xf32>,
    return
  }
  func.func @transform_0(%arg0: i32) -> (i32, i32) {
    %c0_i32 = arith.constant 0 : i32
    %c0_i32_0 = arith.constant 0 : i32
    return %arg0, %c0_i32 : i32, i32
  }
  func.func @transform_1(%arg0: i32) -> (i32, i32) {
    %c0_i32 = arith.constant 0 : i32
    %c0_i32_0 = arith.constant 0 : i32
    %c0_i32_1 = arith.constant 0 : i32
    return %c0_i32, %c0_i32_0 : i32, i32
  }
  func.func @transform_2(%arg0: i32) -> (i32, i32) {
    %c0_i32 = arith.constant 0 : i32
    %c0_i32_0 = arith.constant 0 : i32
    %c0_i32_1 = arith.constant 0 : i32
    return %c0_i32, %c0_i32_0 : i32, i32
  }
  func.func @transform_3(%arg0: i32) -> (i32, i32) {
    %c0_i32 = arith.constant 0 : i32
    %c0_i32_0 = arith.constant 0 : i32
    return %arg0, %c0_i32 : i32, i32
  }
}

</mosaic_0001>

<bundles_post_ra>
// kernel: tpu_custom_call.1
= control target key start
LH: loop header
LB: loop body
LE: loop exit
PB: predicated region body
PF: predicated region fallthrough
CT: control target
= control target key end

     0   :  { %8 = vsyncpa [#allocation3], 0  ;;  %s839_s0 = inlined_call_operand.hbm [shape: f32[16,128], index: 0, kind: input, shape index: {}]   ;;  %s840_s1 = inlined_call_operand.hbm [shape: f32[128,128], index: 1, kind: input, shape index: {}]   ;;  %s841_s2 = inlined_call_operand.vmem [shape: f32[1,128], index: 2, kind: input, shape index: {}]   ;;  %s842_s3 = inlined_call_operand.hbm [shape: f32[16,128], index: 3, kind: output, shape index: {}]  }
   0x1   :  { %10 = vsyncpa [#allocation3 + $0x1], 0 }
   0x2   :  { %11 = vsyncpa [#allocation6], 0 }
   0x3   :  { %12 = vsyncpa [#allocation4], 0 }
   0x4   :  { %14 = vsyncpa [#allocation4 + $0x1], 0  ;;  %s669_s12 = smov 0   ;;  %s671_s13 = smov 0  }
   0x5   :  { %s673_s14 = smov 0   ;;  %s675_s15 = smov 0  }
   0x6 LB: > { %s690_s16 = sadd.s32 4294967295, %s640_s15   ;;  %s390_s17 = sadd.s32 4294967294, %s640_s15   ;;  %s640_s15 = sphi %s675_s15, %s864_s15   ;;  %s636_s14 = sphi %s673_s14, %s863_s14   ;;  %s632_s13 = sphi %s671_s13, %s862_s13   ;;  %s628_s12 = sphi %s669_s12, %s861_s12  }
   0x7   : > { %p40_p0 = scmp.ne.s32.totalorder %s632_s13, %s628_s12  ;;  %p843_p1 = scmp.eq.s32.totalorder %s690_s16, 0 }
   0x8   : > { %p112_p3 = scmp.eq.s32.totalorder %s390_s17, 1  ;;  %p391_p5 = scmp.ge.s32.totalorder %s640_s15, 1 }
   0x9   : > { %p699_p4 = por %p843_p1, %p40_p0  ;;  %p119_p7 = scmp.lt.s32.totalorder %s640_s15, 3 }
   0xa   : > { %p704_p6 = por %p112_p3, %p40_p0  ;;  %s642_s21 = smov [#allocation5]  }
   0xb   : > { %s847_s18 = scalar_select %p699_p4, 1, 0 }
   0xc   : > { %s848_s19 = scalar_select %p704_p6, 1, 0 }
   0xd   : > { %p709_p8 = pnand %p391_p5, %p119_p7  ;;  %s131_s22 = sshll.u32 %s642_s21, 4  ;;  %s132_s22 = int_to_ptr.vmem [resolvable:$true] %s131_s22 }
   0xe   : > { %s723_s24 = sadd.s32 1, %s640_s15   ;;  %s27_s25 = sadd.s32 1, %s636_s14 }
   0xf   : > { %s849_s20 = scalar_select %p709_p8, 1, 0 }
  0x10   : > { %p465_p9 = pneg %p709_p8  ;;  %s24_s26 = ssub.s32 %s640_s15, %s723_s24 }
  0x11   : > { %s529_s27 = scalar_lea.vmem %s132_s22, 2048  ;;  %p537_p5 = scmp.lt.s32.totalorder %s132_s22, %s132_s22 }
  0x12   : > { %p718_p11 = pnand %p465_p9, %p843_p1  ;;  %p530_p13 = scmp.ne.s32.totalorder %s132_s22, %s529_s27 }
  0x13   : > { %p538_p7 = scmp.lt.s32.totalorder %s529_s27, %s529_s27 }
  0x14   : > { %p520_p12 = pneg %p718_p11 }
  0x15   : > { %p539_p10 = por %p538_p7, %p537_p5 }
  0x16   : > { %p532_p0 = pnand %p530_p13, %p520_p12 }
  0x18   : > { %p533_p3 = pneg %p532_p0 }
  0x1a   : > { %p540_p2 = pnand %p539_p10, %p533_p3 }
  0x1c   : > { %543 = shalt.err (!%p540_p2)
}
  0x1d   : > { %s643_s28 = smov 128   ;;  %s644_s29 = smov 8  }
  0x1e   : > { %468 = dma.hbm_to_vmem [thread:$0]  (!%p718_p11), %s840_s1, 2048, %s132_s22, [#allocation6], %s643_s28, %s643_s28, %s644_s29  }
  0x1f   : > { %p25_p9 = scmp.eq.s32.totalorder %s24_s26, 0  ;;  %p34_p12 = scmp.ne.s32.totalorder %s636_s14, %s632_s13 }
  0x20   : > { %p35_p10 = scmp.eq.s32.totalorder %s640_s15, 0  ;;  %p478_p2 = scmp.lt.s32.totalorder %s640_s15, 2 }
  0x21   : > { %s740_s5 = scalar_select %p25_p9, %s636_s14, %s27_s25  }
  0x22   : > { %p36_p13 = por %p35_p10, %p34_p12  ;;  %p851_p0 = scmp.eq.s32.totalorder %s690_s16, 1 }
  0x23   : > { %s148_s7 = sand.u32 1, %s636_s14   ;;  %s395_s8 = sshll.u32 %s640_s15, 7 }
  0x24   : > { %p744_p3 = por %p851_p0, %p34_p12  ;;  %s394_s9 = sshll.u32 %s148_s7, 3 }
  0x25   : > { %s753_s17 = scalar_lea.hbm %s839_s0, %s395_s8  ;;  %s152_s21 = scalar_lea.vmem [#allocation2], %s394_s9 }
  0x26   : > { %s852_s6 = scalar_select %p744_p3, 1, 0 }
  0x27   : > { %s159_s22 = sshll.u32 %s152_s21, 4  ;;  %p755_p11 = pnand %p478_p2, %p36_p13  ;;  %s160_s22 = int_to_ptr.vmem [resolvable:$true] %s159_s22 }
  0x28   : > { %s149_s25 = scalar_lea.sflag [#allocation3], %s148_s7  ;;  %s544_s26 = scalar_lea.hbm %s753_s17, 128 }
  0x29   : > { %p545_p5 = scmp.ne.s32.totalorder %s753_s17, %s544_s26  ;;  %p546_p7 = pneg %p755_p11 }
  0x2a   : > { %s549_s29 = scalar_lea.hbm %s839_s0, 256  ;;  %p550_p10 = scmp.lt.s32.totalorder %s753_s17, %s839_s0 }
  0x2b   : > { %p547_p9 = pnand %p546_p7, %p545_p5  ;;  %p551_p2 = scmp.lt.s32.totalorder %s549_s29, %s544_s26 }
  0x2d   : > { %p548_p12 = pneg %p547_p9  ;;  %p552_p13 = por %p551_p2, %p550_p10 }
  0x2f   : > { %p553_p0 = pnand %p552_p13, %p548_p12 }
  0x31   : > { %556 = shalt.err (!%p553_p0)
}
  0x32   : > { %s557_s8 = scalar_lea.vmem %s160_s22, 128  ;;  %s645_s7 = smov [#allocation2]  }
  0x33   : > { %p558_p1 = scmp.ne.s32.totalorder %s160_s22, %s557_s8  ;;  %s562_s9 = sshll.u32 %s645_s7, 4  ;;  %s563_s9 = int_to_ptr.vmem [resolvable:$false] %s562_s9 }
  0x34   : > { %s564_s10 = scalar_lea.vmem %s563_s9, 256  ;;  %p565_p5 = scmp.lt.s32.totalorder %s160_s22, %s563_s9 }
  0x35   : > { %p560_p6 = pnand %p558_p1, %p546_p7  ;;  %p566_p9 = scmp.lt.s32.totalorder %s564_s10, %s557_s8 }
  0x37   : > { %p561_p3 = pneg %p560_p6  ;;  %p567_p4 = por %p566_p9, %p565_p5 }
  0x39   : > { %p568_p8 = pnand %p567_p4, %p561_p3 }
  0x3b   : > { %571 = shalt.err (!%p568_p8)
}
  0x3c   : > { %472 = dma.hbm_to_vmem [thread:$0]  (!%p755_p11), %s753_s17, 128, %s160_s22, %s149_s25  }
  0x3d   : > { %p854_p12 = scmp.ne.s32.totalorder %s849_s20, 0 }
  0x3e   : > { %s776_s11 = sand.u32 (!%p854_p12), 1, %s632_s13   ;;  %p855_p1 = scmp.ne.s32.totalorder (!%p854_p12), %s847_s18, 0 }
  0x3f   : > { %168 = sbr.rel (%p854_p12) target bundleno = 313 (0x139), region = 32  ;;  %s397_s21 = sshll.u32 (!%p854_p12), %s776_s11, 3 }
  0x40   : > { %s171_s26 = scalar_lea.sflag (!%p854_p12), [#allocation3], %s776_s11  ;;  %s782_s27 = scalar_lea.vmem (!%p854_p12), [#allocation2], %s397_s21 }
  0x44   : > { %615 = dma.done.wait (%p855_p1), %s171_s26, 128  }
  0x45   : > { %617 = vsyncadd (%p855_p1), %s171_s26, 4294967168  ;;  %p856_p4 = scmp.eq.s32.totalorder %s690_s16, 0 }
  0x47   : > { %619 = dma.done.wait (%p856_p4), [#allocation6], 2048   ;;  %p857_p6 = pmov %p856_p4 }
  0x48   : > { %v646_v0 = vmov 0.0   ;;  %vm647_vm0 = vmmov 0   ;;  %v217_v1 = vld [vmem:[#allocation5 + $0x78] sm:$0xff]  ;;  %v216_v2 = vld [vmem:[#allocation5 + $0x70] sm:$0xff]  ;;  %v215_v3 = vld [vmem:[#allocation5 + $0x68] sm:$0xff]  ;;  %s402_s17 = sshll.u32 %s690_s16, 7 }
  0x49   : > { %621 = vsyncadd (%p857_p6), [#allocation6], 4294965248  ;;  %422 = vmatprep.subr.mxu0 %v646_v0  ;;  %454 = vmatprep.mubr.msk.f32.mxu0 %vm647_vm0, %v646_v0  ;;  %v214_v4 = vld [vmem:[#allocation5 + $0x60] sm:$0xff]  ;;  %v213_v5 = vld [vmem:[#allocation5 + $0x58] sm:$0xff]  ;;  %s200_s22 = scalar_lea.vmem [#allocation7], %s397_s21  ;;  %s802_s29 = scalar_lea.hbm %s842_s3, %s402_s17 }
  0x4a   : > { %423 = vmatpush3.msra.mxu0 %v217_v1  ;;  %v212_v6 = vld [vmem:[#allocation5 + $0x50] sm:$0xff]  ;;  %v211_v7 = vld [vmem:[#allocation5 + $0x48] sm:$0xff]  ;;  %v210_v8 = vld [vmem:[#allocation5 + $0x40] sm:$0xff]  ;;  %s310_s23 = sshll.u32 %s200_s22, 4  ;;  %s297_s30 = scalar_lea.sflag [#allocation4], %s776_s11  ;;  %s311_s23 = int_to_ptr.vmem [resolvable:$true] %s310_s23 }
  0x4b   : > { %424 = vmatprep.subr.mxu0 %v646_v0  ;;  %v209_v9 = vld [vmem:[#allocation5 + $0x38] sm:$0xff]  ;;  %v208_v10 = vld [vmem:[#allocation5 + $0x30] sm:$0xff]  ;;  %v207_v11 = vld [vmem:[#allocation5 + $0x28] sm:$0xff]  ;;  %s572_s4 = scalar_lea.vmem %s311_s23, 128  ;;  %p858_p3 = scmp.ne.s32.totalorder %s852_s6, 0 }
  0x4c   : > { %425 = vmatpush3.msra.mxu0 %v216_v2  ;;  %v206_v12 = vld [vmem:[#allocation5 + $0x20] sm:$0xff]  ;;  %v205_v13 = vld [vmem:[#allocation5 + $0x18] sm:$0xff]  ;;  %v204_v14 = vld [vmem:[#allocation5 + $0x10] sm:$0xff]  ;;  %p573_p8 = scmp.ne.s32.totalorder %s311_s23, %s572_s4  ;;  %s648_s16 = smov [#allocation7]  }
  0x4d   : > { %426 = vmatprep.subr.mxu0 %v646_v0  ;;  %v203_v15 = vld [vmem:[#allocation5 + $0x8] sm:$0xff]  ;;  %v202_v16 = vld [vmem:[#allocation5] sm:$0xff]  ;;  %v201_v17 = vld [vmem:[%s782_s27] sm:$0xff]  ;;  %s576_s8 = sshll.u32 %s648_s16, 4  ;;  %s577_s8 = int_to_ptr.vmem [resolvable:$false] %s576_s8 }
  0x4e   : > { %427 = vmatpush3.msra.mxu0 %v215_v3  ;;  %v400_v18 = vld [vmem:[%s841_s2] ss:$0 sm:$0xff]  ;;  %p574_p11 = pnand %p573_p8, %p858_p3  ;;  %s578_s7 = scalar_lea.vmem %s577_s8, 256 }
  0x4f   : > { %428 = vmatprep.subr.mxu0 %v646_v0  ;;  %p579_p10 = scmp.lt.s32.totalorder %s311_s23, %s577_s8  ;;  %p580_p2 = scmp.lt.s32.totalorder %s578_s7, %s572_s4 }
  0x50   : > { %429 = vmatpush3.msra.mxu0 %v214_v4  ;;  %p575_p7 = pneg %p574_p11 }
  0x51   : > { %430 = vmatprep.subr.mxu0 %v646_v0  ;;  %p581_p13 = por %p580_p2, %p579_p10 }
  0x52   : > { %431 = vmatpush3.msra.mxu0 %v213_v5 }
  0x53   : > { %432 = vmatprep.subr.mxu0 %v646_v0  ;;  %p582_p0 = pnand %p581_p13, %p575_p7 }
  0x54   : > { %433 = vmatpush3.msra.mxu0 %v212_v6 }
  0x55   : > { %434 = vmatprep.subr.mxu0 %v646_v0 }
  0x56   : > { %435 = vmatpush3.msra.mxu0 %v211_v7 }
  0x57   : > { %436 = vmatprep.subr.mxu0 %v646_v0 }
  0x58   : > { %437 = vmatpush3.msra.mxu0 %v210_v8 }
  0x59   : > { %438 = vmatprep.subr.mxu0 %v646_v0 }
  0x5a   : > { %439 = vmatpush3.msra.mxu0 %v209_v9 }
  0x5b   : > { %440 = vmatprep.subr.mxu0 %v646_v0 }
  0x5c   : > { %441 = vmatpush3.msra.mxu0 %v208_v10 }
  0x5d   : > { %442 = vmatprep.subr.mxu0 %v646_v0 }
  0x5e   : > { %443 = vmatpush3.msra.mxu0 %v207_v11 }
  0x5f   : > { %444 = vmatprep.subr.mxu0 %v646_v0 }
  0x60   : > { %445 = vmatpush3.msra.mxu0 %v206_v12 }
  0x61   : > { %446 = vmatprep.subr.mxu0 %v646_v0 }
  0x62   : > { %447 = vmatpush3.msra.mxu0 %v205_v13 }
  0x63   : > { %448 = vmatprep.subr.mxu0 %v646_v0 }
  0x64   : > { %449 = vmatpush3.msra.mxu0 %v204_v14 }
  0x65   : > { %450 = vmatprep.subr.mxu0 %v646_v0 }
  0x66   : > { %451 = vmatpush3.msra.mxu0 %v203_v15 }
  0x67   : > { %452 = vmatprep.subr.mxu0 %v646_v0 }
  0x68   : > { %453 = vmatpush3.msra.mxu0 %v202_v16 }
  0x69   : > { %455 = vmatmul.mubr.f32.vlgmr.msra.gmra.mxu0 %v201_v17 }
 0x129   : > { %v291_v19 = vpop.f32.mrf.mxu0 }
 0x12a   : > { %v292_v20 = vadd.f32 %v400_v18, %v291_v19 }
 0x12b   : > { %v456_v21 = vpop.f32.mrf.mxu0 }
 0x12c   : > { %295 = vst [vmem:[%s200_s22] sm:$0xff] %v292_v20 }
 0x12d   : > { %585 = shalt.err (!%p582_p0)
}
 0x12e   : > { %s586_s9 = scalar_lea.hbm %s802_s29, 128  ;;  %s590_s21 = scalar_lea.hbm %s842_s3, 256 }
 0x12f   : > { %p587_p5 = scmp.ne.s32.totalorder %s802_s29, %s586_s9  ;;  %p591_p1 = scmp.lt.s32.totalorder %s802_s29, %s842_s3 }
 0x130   : > { %p592_p4 = scmp.lt.s32.totalorder %s590_s21, %s586_s9 }
 0x131   : > { %p588_p9 = pnand %p587_p5, %p858_p3 }
 0x132   : > { %p593_p6 = por %p592_p4, %p591_p1 }
 0x133   : > { %p589_p12 = pneg %p588_p9 }
 0x135   : > { %p594_p8 = pnand %p593_p6, %p589_p12 }
 0x137   : > { %597 = shalt.err (!%p594_p8)
}
 0x138   : > { %463 = dma.vmem_to_hbm [thread:$0]  (%p858_p3), %s311_s23, 128, %s802_s29, %s297_s30  }
 0x139 PF: > { %s322_s18 = sand.u32 1, %s628_s12   ;;  %p859_p11 = scmp.ne.s32.totalorder %s848_s19, 0 }
 0x13a   : > { %p860_p7 = scmp.ge.s32.totalorder %s640_s15, 2  ;;  %s323_s20 = scalar_lea.sflag [#allocation4], %s322_s18 }
 0x13c   : > { %p474_p10 = pnand %p860_p7, %p859_p11 }
 0x13e   : > { %p475_p2 = pneg %p474_p10 }
 0x140   : > { %623 = dma.done.wait (%p475_p2), %s323_s20, 128  }
 0x141   : > { %625 = vsyncadd (%p475_p2), %s323_s20, 4294967168  ;;  %p17_p13 = scmp.ge.s32.totalorder %s723_s24, 4   ;;  %s861_s12 = smov %s632_s13 }
 0x142   : > { %s862_s13 = smov %s636_s14  ;;  %s863_s14 = smov %s740_s5 }
 0x143   : > { %s864_s15 = smov %s723_s24  ;;  %19 = sbr.rel (!%p17_p13) target bundleno = 6 (0x6), region = 81 }
 0x148   :  { %328 = vsyncpa [#allocation3], 1 }
 0x149   :  { %330 = vsyncpa [#allocation3 + $0x1], 1 }
 0x14a   :  { %331 = vsyncpa [#allocation6], 1 }
 0x14b   :  { %332 = vsyncpa [#allocation4], 1 }
 0x14c   :  { %334 = vsyncpa [#allocation4 + $0x1], 1 }

</bundles_post_ra>
